<compile_context>
chip_gen: v5e
topology: v5e:2x2
jax: 0.10.0
libtpu: 0.0.40
codegen_flags: <defaults>
</compile_context>

<pallas_src>
import jax
import jax.numpy as jnp
from jax import lax
from jax.experimental import pallas as pl
from jax.experimental.pallas import tpu as pltpu


def _normalize_kernel(x_ref, tmean_ref, tstd_ref, o_ref):
    # One block = (TC, HW): TC channels on sublanes, full H*W row on lanes.
    x = x_ref[...].astype(jnp.float32)
    n = x.shape[-1]
    inv_nm1 = 1.0 / float(max(n - 1, 1))                     # torch.std: unbiased (ddof=1)

    mu = jnp.mean(x, axis=-1, keepdims=True)                 # cross-lane reduce (XLU)
    xc = x - mu
    var = jnp.sum(xc * xc, axis=-1, keepdims=True) * inv_nm1

    # Fold (1/sd) and target_std into one per-channel scale; rsqrt runs on the
    # EUP (separate bundle slot), so the per-element work is one mul + one add.
    scale = tstd_ref[...].astype(jnp.float32) * lax.rsqrt(var)
    y = xc * scale + tmean_ref[...].astype(jnp.float32)
    o_ref[...] = y.astype(o_ref.dtype)


def normalize(x, means=0.0, stds=1.0, *, max_block_bytes=4 * 1024 * 1024):
    """Pallas equivalent of Normalize(means, stds).forward(x) for x of shape (C, H, W)."""
    assert x.ndim == 3, "Normalize expects a (C, H, W) tensor"
    C, H, W = x.shape
    HW = H * W

    # Per-channel target mean/std (scalars broadcast to every channel).
    t_means = jnp.broadcast_to(jnp.asarray(means, jnp.float32).reshape(-1), (C,)).reshape(C, 1)
    t_stds = jnp.broadcast_to(jnp.asarray(stds, jnp.float32).reshape(-1), (C,)).reshape(C, 1)

    # Lane-dense 2D view: channels -> sublanes, H*W -> lanes.
    x2 = x.reshape(C, HW)

    # Channel tile: as many full spatial rows as fit in ~max_block_bytes per
    # buffer. in+out, double-buffered => ~4x this in VMEM, comfortably inside
    # the default scoped limit on every TPU generation (incl. v7x 64 MiB VMEM).
    row_bytes = HW * x.dtype.itemsize
    max_rows = max(1, max_block_bytes // max(row_bytes, 1))
    if C <= max_rows:
        tc = C                                  # whole channel axis, one block
    else:
        tc = max(8, (max_rows // 8) * 8)        # keep sublane dim a multiple of 8
    grid = (pl.cdiv(C, tc),)

    out2 = pl.pallas_call(
        _normalize_kernel,
        out_shape=jax.ShapeDtypeStruct((C, HW), x.dtype),
        grid_spec=pltpu.PrefetchScalarGridSpec(
            num_scalar_prefetch=0,
            grid=grid,
            in_specs=[
                pl.BlockSpec((tc, HW), lambda i: (i, 0)),   # x rows
                pl.BlockSpec((tc, 1), lambda i: (i, 0)),    # target means
                pl.BlockSpec((tc, 1), lambda i: (i, 0)),    # target stds
            ],
            out_specs=pl.BlockSpec((tc, HW), lambda i: (i, 0)),
        ),
        compiler_params=pltpu.CompilerParams(
            dimension_semantics=("parallel",),  # independent channel blocks (megacore-shardable)
        ),
    )(x2, t_means, t_stds)

    return out2.reshape(C, H, W)


if __name__ == "__main__":
    key = jax.random.PRNGKey(0)
    # Small (C, H, W) input consistent with the module (mean/std over dims (1,2)).
    C, H, W = 4, 16, 16
    kx, _ = jax.random.split(key)
    x = jax.random.normal(kx, (C, H, W), dtype=jnp.float32) * 3.0 + 0.7
    means = jnp.array([0.5, -0.25, 1.0, 0.0], dtype=jnp.float32)
    stds = jnp.array([1.0, 2.0, 0.5, 1.5], dtype=jnp.float32)

    y = normalize(x, means, stds)
    y = jax.block_until_ready(y)

    # Pure-JAX reference with torch semantics (torch.std is unbiased / ddof=1).
    mu = x.mean(axis=(1, 2), keepdims=True)
    sd = x.std(axis=(1, 2), keepdims=True, ddof=1)
    ref = (x - mu) / sd * stds[:, None, None] + means[:, None, None]

    assert y.shape == ref.shape, (y.shape, ref.shape)
    assert y.dtype == ref.dtype, (y.dtype, ref.dtype)
    assert bool(jnp.allclose(y, ref, rtol=1e-5, atol=1e-5)), float(jnp.max(jnp.abs(y - ref)))

    print("KERNEL_OK")
</pallas_src>

<mosaic_0001>
module attributes {stable_mosaic.version = 11 : i64} {
  func.func @_normalize_kernel(%arg0: i32, %arg1: memref<4x256xf32, #tpu.memory_space<vmem>>, %arg2: memref<4x1xf32, #tpu.memory_space<vmem>>, %arg3: memref<4x1xf32, #tpu.memory_space<vmem>>, %arg4: memref<4x256xf32, #tpu.memory_space<vmem>>) attributes {dimension_semantics = [#tpu.dimension_semantics<parallel>], iteration_bounds = array<i64: 1>, scalar_prefetch = 0 : i64, scratch_operands = 0 : i64, tpu.core_type = #tpu.core_type<tc>, window_params = [{transform_indices = @transform_0, window_bounds = array<i64: 4, 256>}, {transform_indices = @transform_1, window_bounds = array<i64: 4, 1>}, {transform_indices = @transform_2, window_bounds = array<i64: 4, 1>}, {transform_indices = @transform_3, window_bounds = array<i64: 4, 256>}]} {
    %c0 = arith.constant 0 : index
    %c0_0 = arith.constant 0 : index
    %0 = vector.load %arg1[%c0, %c0_0] : memref<4x256xf32, #tpu.memory_space<vmem>>, vector<4x256xf32>
    %cst = arith.constant dense<0.000000e+00> : vector<4xf32>
    %1 = vector.multi_reduction <add>, %0, %cst [1] : vector<4x256xf32> to vector<4xf32>
    %2 = vector.shape_cast %1 : vector<4xf32> to vector<4x1xf32>
    %cst_1 = arith.constant 2.560000e+02 : f32
    %3 = vector.broadcast %cst_1 : f32 to vector<4x1xf32>
    %4 = arith.divf %2, %3 : vector<4x1xf32>
    %5 = vector.broadcast %4 : vector<4x1xf32> to vector<4x256xf32>
    %6 = arith.subf %0, %5 : vector<4x256xf32>
    %7 = arith.mulf %6, %6 : vector<4x256xf32>
    %cst_2 = arith.constant dense<0.000000e+00> : vector<4xf32>
    %8 = vector.multi_reduction <add>, %7, %cst_2 [1] : vector<4x256xf32> to vector<4xf32>
    %9 = vector.shape_cast %8 : vector<4xf32> to vector<4x1xf32>
    %cst_3 = arith.constant 0.00392156886 : f32
    %10 = vector.broadcast %cst_3 : f32 to vector<4x1xf32>
    %11 = arith.mulf %9, %10 : vector<4x1xf32>
    %c0_4 = arith.constant 0 : index
    %c0_5 = arith.constant 0 : index
    %12 = vector.load %arg3[%c0_4, %c0_5] : memref<4x1xf32, #tpu.memory_space<vmem>>, vector<4x1xf32>
    %13 = math.rsqrt %11 : vector<4x1xf32>
    %14 = arith.mulf %12, %13 : vector<4x1xf32>
    %15 = vector.broadcast %14 : vector<4x1xf32> to vector<4x256xf32>
    %16 = arith.mulf %6, %15 : vector<4x256xf32>
    %c0_6 = arith.constant 0 : index
    %c0_7 = arith.constant 0 : index
    %17 = vector.load %arg2[%c0_6, %c0_7] : memref<4x1xf32, #tpu.memory_space<vmem>>, vector<4x1xf32>
    %18 = vector.broadcast %17 : vector<4x1xf32> to vector<4x256xf32>
    %19 = arith.addf %16, %18 : vector<4x256xf32>
    %c0_8 = arith.constant 0 : index
    %c0_9 = arith.constant 0 : index
    %20 = vector.load %arg4[%c0_8, %c0_9] : memref<4x256xf32, #tpu.memory_space<vmem>>, vector<4x256xf32>
    tpu.vector_store %arg4[%c0_8, %c0_9], %19 {strides = array<i32>} : memref<4x256xf32, #tpu.memory_space<vmem>>, vector<4x256xf32>,
    return
  }
  func.func @transform_0(%arg0: i32) -> (i32, i32) {
    %c0_i32 = arith.constant 0 : i32
    %c0_i32_0 = arith.constant 0 : i32
    return %arg0, %c0_i32 : i32, i32
  }
  func.func @transform_1(%arg0: i32) -> (i32, i32) {
    %c0_i32 = arith.constant 0 : i32
    %c0_i32_0 = arith.constant 0 : i32
    return %arg0, %c0_i32 : i32, i32
  }
  func.func @transform_2(%arg0: i32) -> (i32, i32) {
    %c0_i32 = arith.constant 0 : i32
    %c0_i32_0 = arith.constant 0 : i32
    return %arg0, %c0_i32 : i32, i32
  }
  func.func @transform_3(%arg0: i32) -> (i32, i32) {
    %c0_i32 = arith.constant 0 : i32
    %c0_i32_0 = arith.constant 0 : i32
    return %arg0, %c0_i32 : i32, i32
  }
}

</mosaic_0001>

<bundles_post_ra>
// kernel: tpu_custom_call.1
= control target key start
LH: loop header
LB: loop body
LE: loop exit
PB: predicated region body
PF: predicated region fallthrough
CT: control target
= control target key end

     0   :  { %s182_s0 = inlined_call_operand.vmem [shape: f32[4,256], index: 0, kind: input, shape index: {}]   ;;  %s183_s1 = inlined_call_operand.vmem [shape: f32[4,1], index: 1, kind: input, shape index: {}]   ;;  %s184_s2 = inlined_call_operand.vmem [shape: f32[4,1], index: 2, kind: input, shape index: {}]   ;;  %s185_s3 = inlined_call_operand.hbm [shape: f32[4,256], index: 3, kind: output, shape index: {}]  }
   0x1   :  { %v15_v0 = vld [vmem:[%s182_s0] sm:$0xff] }
   0x2   :  { %17 = vst [vmem:[#allocation1] ss:$2 sm:$0xff] %v15_v0 }
   0x3   :  { %8 = vsyncpa [#allocation3], 0  ;;  %vm22_vm0 = vcmask 1043456   ;;  %v142_v6 = vmov 256.0   ;;  %v143_v12 = vmov 839922192  }
   0x4   :  { %112 = vrcp.f32 %v142_v6  ;;  %v38_v13 = vunpack.c.l.s4 %v143_v12  ;;  %v144_v26 = vmov 0   ;;  %v56_v34 = vld [vmem:[%s184_s2] sm:$0xf]  ;;  %s145_s17 = smov [#allocation2]   ;;  %s97_s21 = sshll.u32 %s185_s3, 4  ;;  %s98_s21 = int_to_ptr.hbm [resolvable:$true] %s97_s21 }
   0x5   :  { %110 = vset.pattern.permute.xlu1 %v144_v26  ;;  %111 = vset.pattern.permute.xlu0 %v144_v26  ;;  %v78_v38 = vld [vmem:[%s183_s1] sm:$0xf]  ;;  %s95_s18 = sshll.u32 %s145_s17, 4  ;;  %s96_s18 = int_to_ptr.vmem [resolvable:$true] %s95_s18 }
   0x6   :  { %v39_v15 = vunpack.c.0.s8 %v38_v13 }
   0x9   :  { %v18_v1 = vld.sshfl [vmem:[#allocation1] sm:$0xff pattern:$0x75316420]  ;;  %v19_v2 = vld.sshfl [vmem:[#allocation1 + $0x8] sm:$0xff pattern:$0x75316420] }
   0xa   :  { %v23_v3 = vsel %vm22_vm0, %v18_v1, 0.0  ;;  %v24_v4 = vsel %vm22_vm0, %v19_v2, 0.0  ;;  %v113_v7 = vpop.eup %112 }
   0xb   :  { %v25_v5 = vadd.f32 %v24_v4, %v23_v3  ;;  %v29_v8 = vmul.f32 256.0, %v113_v7  ;;  %vm33_vm1 = vweird.f32 %v113_v7 }
   0xd   :  { %26 = vadd.xlane.f32.xlu0 %v25_v5  ;;  %v30_v9 = vsub.f32 1.0, %v29_v8 }
   0xf   :  { %v31_v10 = vmul.f32 %v113_v7, %v30_v9 }
  0x11   :  { %v32_v11 = vadd.f32 %v113_v7, %v31_v10 }
  0x13   :  { %v34_v14 = vsel %vm33_vm1, %v113_v7, %v32_v11 }
  0x80   :  { %v27_v16 = vpop.xlane.xlu0 %26 }
  0x81   :  { %v35_v17 = vmul.f32 %v34_v14, %v27_v16 }
  0x83   :  { %v40_v18 = vperm.slane %v35_v17, %v39_v15 }
  0x85   :  { %v42_v19 = vsub.f32 %v15_v0, %v40_v18 }
  0x87   :  { %v43_v20 = vmul.f32 %v42_v19, %v42_v19 }
  0x89   :  { %45 = vst [vmem:[#allocation1] ss:$2 sm:$0xff] %v43_v20 }
  0x90   :  { %v46_v21 = vld.sshfl [vmem:[#allocation1] sm:$0xff pattern:$0x75316420]  ;;  %v47_v22 = vld.sshfl [vmem:[#allocation1 + $0x8] sm:$0xff pattern:$0x75316420] }
  0x91   :  { %v50_v23 = vsel %vm22_vm0, %v46_v21, 0.0  ;;  %v51_v24 = vsel %vm22_vm0, %v47_v22, 0.0 }
  0x92   :  { %v52_v25 = vadd.f32 %v51_v24, %v50_v23 }
  0x94   :  { %53 = vadd.xlane.f32.xlu0 %v52_v25 }
 0x107   :  { %v54_v27 = vpop.xlane.xlu0 %53 }
 0x108   :  { %v55_v28 = vmul.f32 0.003921569, %v54_v27 }
 0x10a   :  { %114 = vrsqrt.f32 %v55_v28  ;;  %vm63_vm3 = vweird.f32 %v55_v28 }
 0x110   :  { %v115_v29 = vpop.eup %114 }
 0x111   :  { %v58_v30 = vmul.f32 %v115_v29, %v55_v28  ;;  %vm64_vm2 = vweird.f32 %v115_v29 }
 0x112   :  { %vm65_vm4 = vmor %vm63_vm3, %vm64_vm2 }
 0x113   :  { %v59_v31 = vmul.f32 %v115_v29, %v58_v30 }
 0x115   :  { %v60_v32 = vmul.f32 0.5, %v59_v31 }
 0x117   :  { %v61_v33 = vsub.f32 1.5, %v60_v32 }
 0x119   :  { %v62_v35 = vmul.f32 %v115_v29, %v61_v33 }
 0x11b   :  { %v66_v36 = vsel %vm65_vm4, %v115_v29, %v62_v35 }
 0x11c   :  { %v67_v37 = vmul.f32 %v66_v36, %v56_v34 }
 0x11e   :  { %70 = vperm.xlu1 %110, %v67_v37  }
 0x126   :  { %81 = vperm.xlu1 %110, %v78_v38  }
 0x190   :  { %v71_v39 = vpop.permute.xlu1 %70 }
 0x191   :  { %v75_v40 = vperm.slane %v71_v39, %v39_v15 }
 0x193   :  { %v77_v42 = vmul.f32 %v75_v40, %v42_v19 }
 0x198   :  { %v82_v41 = vpop.permute.xlu1 %81 }
 0x199   :  { %v86_v43 = vperm.slane %v82_v41, %v39_v15 }
 0x19b   :  { %v88_v44 = vadd.f32 %v86_v43, %v77_v42 }
 0x19d   :  { %89 = vst [vmem:[#allocation2] sm:$0xff] %v88_v44 }
 0x19e   :  { %100 = dma.vmem_to_hbm [thread:$0]  %s96_s18, 128, %s98_s21, [#allocation3]  }
 0x19f   :  { %140 = dma.done.wait [#allocation3], 128  }
 0x1a0   :  { %141 = vsyncadd [#allocation3], 4294967168 }
 0x1a1   :  { %105 = vsyncpa [#allocation3], 1 }

</bundles_post_ra>
